<compile_context>
chip_gen: v5e
topology: v5e:2x2
jax: 0.10.0
libtpu: 0.0.40
codegen_flags: <defaults>
</compile_context>

<pallas_src>
import functools

import jax
import jax.numpy as jnp
from jax.experimental import pallas as pl
from jax.experimental.pallas import tpu as pltpu


# --------------------------------------------------------------------------
# Kernel
# --------------------------------------------------------------------------
def _layernorm_kernel(x_ref, gamma_ref, beta_ref, o_ref, *, eps, inv_n, bf16_affine):
    """One grid step: LayerNorm over the last dim of a (tile_rows, hidden) tile."""
    x = x_ref[...]                              # (tile_rows, hidden), input dtype
    xf = x.astype(jnp.float32)

    # One-pass statistics, accumulated in f32.
    s1 = jnp.sum(xf, axis=-1, keepdims=True)
    s2 = jnp.sum(xf * xf, axis=-1, keepdims=True)
    mean = s1 * inv_n
    var = s2 * inv_n - mean * mean
    var = jnp.maximum(var, 0.0)                 # guard tiny negatives from cancellation
    inv = jax.lax.rsqrt(var + eps)              # eps inside the sqrt (TF style)

    if bf16_affine:
        # v6e/v7x: bf16 VALU runs 2 elems/lane; keep only the stats in f32.
        cd = jnp.bfloat16
        y = (x.astype(cd) - mean.astype(cd)) * inv.astype(cd)
        g = gamma_ref[...].astype(cd)
        b = beta_ref[...].astype(cd)
        o_ref[...] = (g * y + b).astype(o_ref.dtype)
    else:
        y = (xf - mean) * inv
        o_ref[...] = (gamma_ref[...] * y + beta_ref[...]).astype(o_ref.dtype)


# --------------------------------------------------------------------------
# Host-side sizing helpers
# --------------------------------------------------------------------------
def _sublane_multiple(dtype):
    # f32 -> 8, bf16 -> 16, int8/fp8 -> 32 (sub-32-bit dtypes pack along sublanes)
    itemsize = jnp.dtype(dtype).itemsize
    return max(8, 32 // max(itemsize, 1))


def _round_up(n, m):
    return ((n + m - 1) // m) * m


def _device_kind():
    try:
        return jax.devices()[0].device_kind.lower()
    except Exception:
        return ""


def _vmem_capacity_bytes():
    try:
        cap = getattr(pltpu.get_tpu_info(), "vmem_capacity_bytes", None)
        if cap:
            return int(cap)
    except Exception:
        pass
    return 64 << 20  # conservative fallback (v7x per-core VMEM)


def _per_row_vmem_bytes(hidden, in_dtype, out_dtype, bf16_affine):
    in_b = jnp.dtype(in_dtype).itemsize
    out_b = jnp.dtype(out_dtype).itemsize
    io = 2 * in_b + 2 * out_b                   # double-buffered input + output tiles
    if in_b == 4:
        work = 2 * 4                            # f32 x copy + ~1 fused f32 temporary
    elif bf16_affine:
        work = 4 + 2 * 2                        # f32 stats copy + bf16 affine copies
    else:
        work = 3 * 4                            # f32 cast of x + f32 temporaries
    return hidden * (io + work)


def _choose_tile_rows(rows, hidden, in_dtype, out_dtype, bf16_affine,
                      vmem_capacity, max_tile_rows):
    """Largest row tile whose double-buffered I/O + working set fits ~35% of VMEM."""
    sub = _sublane_multiple(in_dtype)
    budget = int(0.35 * vmem_capacity)
    per_row = _per_row_vmem_bytes(hidden, in_dtype, out_dtype, bf16_affine)
    tile = budget // max(per_row, 1)
    tile = min(tile, max_tile_rows, _round_up(rows, sub))
    tile = max(sub, (tile // sub) * sub)
    return int(tile), per_row


def _even_grid_tile(rows, tile, sub):
    """Shrink tile (in sublane steps) so the 1-D grid has an even, >=2 block
    count -- keeps both v7x TensorCores busy.  No-op when rows are tiny."""
    if rows <= sub or tile <= sub:
        return tile
    t = tile
    while t > sub:
        g = -(-rows // t)
        if g >= 2 and g % 2 == 0:
            return t
        t -= sub
    # Couldn't get an even count; at least make sure both cores get a block.
    t = tile
    while t > sub and -(-rows // t) < 2:
        t -= sub
    return t


# --------------------------------------------------------------------------
# Public wrapper
# --------------------------------------------------------------------------
def bert_layer_norm(x, gamma, beta, eps=1e-12, tile_rows=None):
    """x: [..., hidden]; gamma, beta: [hidden]. Matches PyTorch BertLayerNorm.forward."""
    orig_shape = x.shape
    hidden = int(orig_shape[-1])
    rows = 1
    for d in orig_shape[:-1]:
        rows *= int(d)

    x2 = x.reshape(rows, hidden)
    gamma2 = gamma.astype(jnp.float32).reshape(1, hidden)
    beta2 = beta.astype(jnp.float32).reshape(1, hidden)

    kind = _device_kind()
    vmem_capacity = _vmem_capacity_bytes()
    is_pre_v6 = any(t in kind for t in ("v2", "v3", "v4", "v5"))
    bf16_affine = (jnp.dtype(x2.dtype) == jnp.bfloat16) and not is_pre_v6
    max_tile_rows = 1024 if is_pre_v6 else 4096

    if tile_rows is None:
        tile_rows, per_row = _choose_tile_rows(
            rows, hidden, x2.dtype, x2.dtype, bf16_affine,
            vmem_capacity, max_tile_rows)
        if "v7" in kind:
            tile_rows = _even_grid_tile(rows, tile_rows, _sublane_multiple(x2.dtype))
    else:
        per_row = _per_row_vmem_bytes(hidden, x2.dtype, x2.dtype, bf16_affine)

    grid = (pl.cdiv(rows, tile_rows),)

    # Scoped-VMEM limit sized from the actual tile, with headroom for Mosaic's
    # internal scratch; capped well below the physical per-core VMEM.
    io_work_bytes = tile_rows * per_row
    param_bytes = 2 * 2 * hidden * 4            # gamma + beta, double-buffered f32
    vmem_limit = int(1.25 * (io_work_bytes + param_bytes)) + (8 << 20)
    vmem_limit = max(16 << 20, min(vmem_limit, int(0.75 * vmem_capacity)))

    inv_n = 1.0 / float(hidden)

    out = pl.pallas_call(
        functools.partial(_layernorm_kernel, eps=eps, inv_n=inv_n,
                          bf16_affine=bf16_affine),
        out_shape=jax.ShapeDtypeStruct((rows, hidden), x.dtype),
        grid_spec=pltpu.PrefetchScalarGridSpec(
            num_scalar_prefetch=0,
            grid=grid,
            in_specs=[
                pl.BlockSpec((tile_rows, hidden), lambda i: (i, 0)),
                pl.BlockSpec((1, hidden), lambda i: (0, 0)),
                pl.BlockSpec((1, hidden), lambda i: (0, 0)),
            ],
            out_specs=pl.BlockSpec((tile_rows, hidden), lambda i: (i, 0)),
        ),
        compiler_params=pltpu.CompilerParams(
            dimension_semantics=("parallel",),
            vmem_limit_bytes=vmem_limit,
        ),
    )(x2, gamma2, beta2)

    return out.reshape(orig_shape)


# --------------------------------------------------------------------------
# Reference + self-test
# --------------------------------------------------------------------------
def _reference(x, gamma, beta, eps):
    x = x.astype(jnp.float32)
    u = jnp.mean(x, axis=-1, keepdims=True)
    s = jnp.mean((x - u) ** 2, axis=-1, keepdims=True)
    return gamma.astype(jnp.float32) * ((x - u) / jnp.sqrt(s + eps)) + beta.astype(jnp.float32)


if __name__ == "__main__":
    key = jax.random.PRNGKey(0)

    # Small shapes consistent with the module's usage: [batch, seq, hidden].
    batch, seq, hidden = 2, 8, 32
    x = jax.random.normal(key, (batch, seq, hidden), dtype=jnp.float32)

    # Parameters initialized exactly as in the PyTorch module __init__:
    gamma = jnp.ones((hidden,), dtype=jnp.float32)
    beta = jnp.zeros((hidden,), dtype=jnp.float32)

    out = jax.block_until_ready(bert_layer_norm(x, gamma, beta, eps=1e-12))
    ref = _reference(x, gamma, beta, 1e-12)
    assert jnp.allclose(out, ref, atol=1e-5, rtol=1e-5), "mismatch vs reference"

    # Ragged-rows case (rows not a multiple of the tile) to exercise the
    # clipped last-block path that replaced the explicit pad/slice.
    x2 = jax.random.normal(jax.random.PRNGKey(1), (3, 7, hidden), dtype=jnp.float32)
    out2 = jax.block_until_ready(bert_layer_norm(x2, gamma, beta, eps=1e-12))
    ref2 = _reference(x2, gamma, beta, 1e-12)
    assert jnp.allclose(out2, ref2, atol=1e-5, rtol=1e-5), "ragged mismatch vs reference"

    # bf16, lane-dense hidden: exercises the (v6e/v7x) bf16 affine path when
    # available; falls back to the f32 path on older chips.
    h3 = 128
    x3 = jax.random.normal(jax.random.PRNGKey(2), (2, 8, h3)).astype(jnp.bfloat16)
    g3 = jnp.ones((h3,), dtype=jnp.float32)
    b3 = jnp.zeros((h3,), dtype=jnp.float32)
    out3 = jax.block_until_ready(bert_layer_norm(x3, g3, b3, eps=1e-12))
    ref3 = _reference(x3, g3, b3, 1e-12)
    assert jnp.allclose(out3.astype(jnp.float32), ref3, atol=3e-2, rtol=3e-2), \
        "bf16 mismatch vs reference"

    print("KERNEL_OK")
</pallas_src>

<mosaic_0001>
module attributes {stable_mosaic.version = 11 : i64} {
  func.func @_layernorm_kernel(%arg0: i32, %arg1: memref<16x32xf32, #tpu.memory_space<vmem>>, %arg2: memref<1x32xf32, #tpu.memory_space<vmem>>, %arg3: memref<1x32xf32, #tpu.memory_space<vmem>>, %arg4: memref<16x32xf32, #tpu.memory_space<vmem>>) attributes {dimension_semantics = [#tpu.dimension_semantics<parallel>], iteration_bounds = array<i64: 1>, scalar_prefetch = 0 : i64, scratch_operands = 0 : i64, tpu.core_type = #tpu.core_type<tc>, window_params = [{transform_indices = @transform_0, window_bounds = array<i64: 16, 32>}, {pipeline_mode = #tpu.pipeline_mode<synchronous>, transform_indices = @transform_1, window_bounds = array<i64: 1, 32>}, {pipeline_mode = #tpu.pipeline_mode<synchronous>, transform_indices = @transform_2, window_bounds = array<i64: 1, 32>}, {transform_indices = @transform_3, window_bounds = array<i64: 16, 32>}]} {
    %c0 = arith.constant 0 : index
    %c0_0 = arith.constant 0 : index
    %0 = vector.load %arg1[%c0, %c0_0] : memref<16x32xf32, #tpu.memory_space<vmem>>, vector<16x32xf32>
    %cst = arith.constant dense<0.000000e+00> : vector<16xf32>
    %1 = vector.multi_reduction <add>, %0, %cst [1] : vector<16x32xf32> to vector<16xf32>
    %2 = vector.shape_cast %1 : vector<16xf32> to vector<16x1xf32>
    %3 = arith.mulf %0, %0 : vector<16x32xf32>
    %cst_1 = arith.constant dense<0.000000e+00> : vector<16xf32>
    %4 = vector.multi_reduction <add>, %3, %cst_1 [1] : vector<16x32xf32> to vector<16xf32>
    %5 = vector.shape_cast %4 : vector<16xf32> to vector<16x1xf32>
    %cst_2 = arith.constant 3.125000e-02 : f32
    %6 = vector.broadcast %cst_2 : f32 to vector<16x1xf32>
    %7 = arith.mulf %2, %6 : vector<16x1xf32>
    %cst_3 = arith.constant 3.125000e-02 : f32
    %8 = vector.broadcast %cst_3 : f32 to vector<16x1xf32>
    %9 = arith.mulf %5, %8 : vector<16x1xf32>
    %10 = arith.mulf %7, %7 : vector<16x1xf32>
    %11 = arith.subf %9, %10 : vector<16x1xf32>
    %cst_4 = arith.constant 0.000000e+00 : f32
    %12 = vector.broadcast %cst_4 : f32 to vector<16x1xf32>
    %13 = arith.maximumf %11, %12 : vector<16x1xf32>
    %cst_5 = arith.constant 9.99999996E-13 : f32
    %14 = vector.broadcast %cst_5 : f32 to vector<16x1xf32>
    %15 = arith.addf %13, %14 : vector<16x1xf32>
    %16 = math.rsqrt %15 : vector<16x1xf32>
    %17 = vector.broadcast %7 : vector<16x1xf32> to vector<16x32xf32>
    %18 = arith.subf %0, %17 : vector<16x32xf32>
    %19 = vector.broadcast %16 : vector<16x1xf32> to vector<16x32xf32>
    %20 = arith.mulf %18, %19 : vector<16x32xf32>
    %c0_6 = arith.constant 0 : index
    %c0_7 = arith.constant 0 : index
    %21 = vector.load %arg2[%c0_6, %c0_7] : memref<1x32xf32, #tpu.memory_space<vmem>>, vector<1x32xf32>
    %22 = vector.broadcast %21 : vector<1x32xf32> to vector<16x32xf32>
    %23 = arith.mulf %22, %20 : vector<16x32xf32>
    %c0_8 = arith.constant 0 : index
    %c0_9 = arith.constant 0 : index
    %24 = vector.load %arg3[%c0_8, %c0_9] : memref<1x32xf32, #tpu.memory_space<vmem>>, vector<1x32xf32>
    %25 = vector.broadcast %24 : vector<1x32xf32> to vector<16x32xf32>
    %26 = arith.addf %23, %25 : vector<16x32xf32>
    %c0_10 = arith.constant 0 : index
    %c0_11 = arith.constant 0 : index
    %27 = vector.load %arg4[%c0_10, %c0_11] : memref<16x32xf32, #tpu.memory_space<vmem>>, vector<16x32xf32>
    tpu.vector_store %arg4[%c0_10, %c0_11], %26 {strides = array<i32>} : memref<16x32xf32, #tpu.memory_space<vmem>>, vector<16x32xf32>,
    return
  }
  func.func @transform_0(%arg0: i32) -> (i32, i32) {
    %c0_i32 = arith.constant 0 : i32
    %c0_i32_0 = arith.constant 0 : i32
    return %arg0, %c0_i32 : i32, i32
  }
  func.func @transform_1(%arg0: i32) -> (i32, i32) {
    %c0_i32 = arith.constant 0 : i32
    %c0_i32_0 = arith.constant 0 : i32
    %c0_i32_1 = arith.constant 0 : i32
    return %c0_i32, %c0_i32_0 : i32, i32
  }
  func.func @transform_2(%arg0: i32) -> (i32, i32) {
    %c0_i32 = arith.constant 0 : i32
    %c0_i32_0 = arith.constant 0 : i32
    %c0_i32_1 = arith.constant 0 : i32
    return %c0_i32, %c0_i32_0 : i32, i32
  }
  func.func @transform_3(%arg0: i32) -> (i32, i32) {
    %c0_i32 = arith.constant 0 : i32
    %c0_i32_0 = arith.constant 0 : i32
    return %arg0, %c0_i32 : i32, i32
  }
}

</mosaic_0001>

<bundles_post_ra>
// kernel: tpu_custom_call.1
= control target key start
LH: loop header
LB: loop body
LE: loop exit
PB: predicated region body
PF: predicated region fallthrough
CT: control target
= control target key end

     0   :  { %8 = vsyncpa [#allocation3], 0  ;;  %s270_s0 = inlined_call_operand.hbm [shape: f32[16,32], index: 0, kind: input, shape index: {}]   ;;  %s271_s1 = inlined_call_operand.hbm [shape: f32[1,32], index: 1, kind: input, shape index: {}]   ;;  %s272_s2 = inlined_call_operand.vmem [shape: f32[1,32], index: 2, kind: input, shape index: {}]   ;;  %s273_s3 = inlined_call_operand.hbm [shape: f32[16,32], index: 3, kind: output, shape index: {}]  }
   0x1   :  { %9 = vsyncpa [#allocation6], 0 }
   0x2   :  { %10 = vsyncpa [#allocation4], 0  ;;  %s15_s14 = sshll.u32 %s270_s0, 4  ;;  %s221_s15 = smov [#allocation2]   ;;  %s16_s14 = int_to_ptr.hbm [resolvable:$true] %s15_s14 }
   0x3   :  { %s17_s16 = sshll.u32 %s221_s15, 4  ;;  %s29_s19 = sshll.u32 %s271_s1, 4  ;;  %s18_s16 = int_to_ptr.vmem [resolvable:$true] %s17_s16  ;;  %s30_s19 = int_to_ptr.hbm [resolvable:$true] %s29_s19 }
   0x4   :  { %s222_s20 = smov 128   ;;  %s223_s21 = smov 8  }
   0x5   :  { %23 = dma.hbm_to_vmem [thread:$0]  %s16_s14, 256, %s18_s16, [#allocation3], %s222_s20, %s222_s20, %s223_s21  }
   0x6   :  { %s224_s22 = smov [#allocation5]  }
   0x7   :  { %s31_s23 = sshll.u32 %s224_s22, 4  ;;  %s32_s23 = int_to_ptr.vmem [resolvable:$true] %s31_s23 }
   0x8   :  { %34 = dma.hbm_to_vmem [thread:$0]  %s30_s19, 16, %s32_s23, [#allocation6]  }
   0x9   :  { %215 = dma.done.wait [#allocation3], 256  }
   0xa   :  { %216 = vsyncadd [#allocation3], 4294967040 }
   0xb   :  { %217 = dma.done.wait [#allocation6], 16  }
   0xc   :  { %218 = vsyncadd [#allocation6], 4294967280  ;;  %vm47_vm0 = vcmask 261120   ;;  %v45_v0 = vld [vmem:[#allocation2] sm:$0xff]  ;;  %v46_v3 = vld [vmem:[#allocation2 + $0x8] sm:$0xff]  ;;  %s225_s24 = smov [#allocation7]  }
   0xd   :  { %v48_v1 = vsel %vm47_vm0, %v45_v0, 0.0  ;;  %v54_v2 = vmul.f32 %v45_v0, %v45_v0  ;;  %v55_v5 = vmul.f32 %v46_v3, %v46_v3  ;;  %v51_v6 = vsel %vm47_vm0, %v46_v3, 0.0  ;;  %v137_v33 = vld [vmem:[#allocation5] ss:$0 sm:$0xff]  ;;  %v138_v37 = vld [vmem:[%s272_s2] ss:$0 sm:$0xff] }
   0xe   :  { %49 = vadd.xlane.f32.xlu0 %v48_v1  ;;  %s116_s25 = sshll.u32 %s225_s24, 4  ;;  %s118_s28 = sshll.u32 %s273_s3, 4  ;;  %s117_s25 = int_to_ptr.vmem [resolvable:$true] %s116_s25  ;;  %s119_s28 = int_to_ptr.hbm [resolvable:$true] %s118_s28 }
   0xf   :  { %v56_v4 = vsel %vm47_vm0, %v54_v2, 0.0  ;;  %v59_v7 = vsel %vm47_vm0, %v55_v5, 0.0 }
  0x10   :  { %57 = vadd.xlane.f32.xlu1 %v56_v4 }
  0x16   :  { %52 = vadd.xlane.f32.xlu0 %v51_v6 }
  0x18   :  { %60 = vadd.xlane.f32.xlu1 %v59_v7 }
  0x81   :  { %v50_v8 = vpop.xlane.xlu0 %49 }
  0x82   :  { %v62_v9 = vmul.f32 0.03125, %v50_v8 }
  0x83   :  { %v58_v10 = vpop.xlane.xlu1 %57 }
  0x84   :  { %v66_v11 = vmul.f32 %v62_v9, %v62_v9  ;;  %v64_v12 = vmul.f32 0.03125, %v58_v10  ;;  %v94_v31 = vsub.f32 %v45_v0, %v62_v9 }
  0x86   :  { %v68_v13 = vsub.f32 %v64_v12, %v66_v11 }
  0x88   :  { %v70_v14 = vmax.f32 %v68_v13, 0.0 }
  0x89   :  { %v53_v15 = vpop.xlane.xlu0 %52 }
  0x8a   :  { %v72_v16 = vadd.f32 1e-12, %v70_v14  ;;  %v63_v17 = vmul.f32 0.03125, %v53_v15 }
  0x8b   :  { %v61_v18 = vpop.xlane.xlu1 %60 }
  0x8c   :  { %139 = vrsqrt.f32 %v72_v16  ;;  %v67_v19 = vmul.f32 %v63_v17, %v63_v17  ;;  %v65_v20 = vmul.f32 0.03125, %v61_v18  ;;  %vm80_vm2 = vweird.f32 %v72_v16 }
  0x8d   :  { %v95_v43 = vsub.f32 %v46_v3, %v63_v17 }
  0x8e   :  { %v69_v21 = vsub.f32 %v65_v20, %v67_v19 }
  0x90   :  { %v71_v22 = vmax.f32 %v69_v21, 0.0 }
  0x92   :  { %v140_v23 = vpop.eup %139  ;;  %v73_v25 = vadd.f32 1e-12, %v71_v22 }
  0x93   :  { %v75_v24 = vmul.f32 %v140_v23, %v72_v16  ;;  %vm81_vm1 = vweird.f32 %v140_v23 }
  0x94   :  { %141 = vrsqrt.f32 %v73_v25  ;;  %vm82_vm3 = vmor %vm80_vm2, %vm81_vm1  ;;  %vm90_vm5 = vweird.f32 %v73_v25 }
  0x95   :  { %v76_v26 = vmul.f32 %v140_v23, %v75_v24 }
  0x97   :  { %v77_v27 = vmul.f32 0.5, %v76_v26 }
  0x99   :  { %v78_v28 = vsub.f32 1.5, %v77_v27 }
  0x9a   :  { %v142_v29 = vpop.eup %141 }
  0x9b   :  { %v79_v30 = vmul.f32 %v140_v23, %v78_v28  ;;  %v85_v32 = vmul.f32 %v142_v29, %v73_v25  ;;  %vm91_vm4 = vweird.f32 %v142_v29 }
  0x9c   :  { %vm92_vm6 = vmor %vm90_vm5, %vm91_vm4 }
  0x9d   :  { %v83_v34 = vsel %vm82_vm3, %v140_v23, %v79_v30  ;;  %v86_v36 = vmul.f32 %v142_v29, %v85_v32 }
  0x9e   :  { %v96_v35 = vmul.f32 %v94_v31, %v83_v34 }
  0x9f   :  { %v87_v38 = vmul.f32 0.5, %v86_v36 }
  0xa0   :  { %v102_v39 = vmul.f32 %v137_v33, %v96_v35 }
  0xa1   :  { %v88_v40 = vsub.f32 1.5, %v87_v38 }
  0xa2   :  { %v108_v41 = vadd.f32 %v138_v37, %v102_v39 }
  0xa3   :  { %v89_v42 = vmul.f32 %v142_v29, %v88_v40 }
  0xa4   :  { %110 = vst.msk [vmem:[#allocation7] sm:$0xff] %vm47_vm0, %v108_v41 }
  0xa5   :  { %v93_v44 = vsel %vm92_vm6, %v142_v29, %v89_v42 }
  0xa6   :  { %v97_v45 = vmul.f32 %v95_v43, %v93_v44 }
  0xa8   :  { %v103_v46 = vmul.f32 %v137_v33, %v97_v45 }
  0xaa   :  { %v109_v47 = vadd.f32 %v138_v37, %v103_v46 }
  0xac   :  { %111 = vst.msk [vmem:[#allocation7 + $0x8] sm:$0xff] %vm47_vm0, %v109_v47 }
  0xad   :  { %124 = dma.vmem_to_hbm [thread:$0]  %s117_s25, 256, %s119_s28, [#allocation4], %s222_s20, %s222_s20, %s223_s21  }
  0xae   :  { %219 = dma.done.wait [#allocation4], 256  }
  0xaf   :  { %220 = vsyncadd [#allocation4], 4294967040 }
  0xb0   :  { %129 = vsyncpa [#allocation3], 1 }
  0xb1   :  { %130 = vsyncpa [#allocation6], 1 }
  0xb2   :  { %131 = vsyncpa [#allocation4], 1 }

</bundles_post_ra>
